<compile_context>
chip_gen: v7x
topology: tpu7x:2x2x1
jax: 0.10.0
libtpu: 0.0.40
codegen_flags: <defaults>
</compile_context>

<pallas_src>
import jax
import jax.numpy as jnp
from jax.experimental import pallas as pl
from jax.experimental.pallas import tpu as pltpu

OUT_DIM = 2        # nn.Linear(dim, 2)
OUT_PAD = 128      # lane-dense padded output width (one full vreg lane width)
_EPS = 1e-12       # l2_norm epsilon (guards a zero column; negligible otherwise)


def _round_up(x, m):
    return (x + m - 1) // m * m


def _pick_batch_tile(B, dim, x_itemsize):
    """Batch-tile rows targeting ~4 MiB of x per tile (multiple of 8 sublanes)."""
    target_bytes = 4 << 20
    tb = target_bytes // max(dim * x_itemsize, 1)
    tb = max(256, min(2048, (tb // 8) * 8))
    b8 = _round_up(B, 8)
    if b8 >= 512:
        # keep at least 2 batch tiles so v7x's second TensorCore has work
        tb = min(tb, _round_up((b8 + 1) // 2, 8))
    return max(8, min(tb, b8))


def _classifier_kernel(x_ref, w_ref, b_ref, o_ref):
    # x_ref: (TB, dim) native dtype; w_ref: (dim, OUT_PAD) bf16; b_ref: (1, OUT_PAD) f32
    x = x_ref[...].astype(w_ref.dtype)                       # in-VMEM cast, hidden under DMA
    acc = jnp.dot(x, w_ref[...], preferred_element_type=jnp.float32)
    o_ref[...] = (acc + b_ref[...]).astype(o_ref.dtype)      # lane-dense, unmasked store


def classifier_forward(x, w_p, b_p, norm_flag: bool):
    """x: (B, dim), any float dtype (kept native; cast happens in-kernel).
    w_p: (dim, OUT_PAD) pre-padded bf16 weight (== weight.T, zero-padded 2 -> 128).
    b_p: (1, OUT_PAD) f32 bias.  Returns (B, 2) f32 logits."""
    B, dim = x.shape
    assert w_p.shape == (dim, OUT_PAD) and b_p.shape == (1, OUT_PAD)

    if norm_flag:
        # l2_norm(weight, axis=0) on the PyTorch (2, dim) layout == per-row
        # normalization of the transposed (dim, 2) weight; padded zero columns do
        # not change the norm.  Done ONCE here rather than per batch tile.
        wf = w_p.astype(jnp.float32)
        inv = jax.lax.rsqrt(jnp.sum(wf * wf, axis=1, keepdims=True) + _EPS)
        w_use = (wf * inv).astype(w_p.dtype)
    else:
        w_use = w_p

    x_itemsize = jnp.dtype(x.dtype).itemsize
    tb = _pick_batch_tile(B, dim, x_itemsize)
    grid = (pl.cdiv(B, tb),)

    # VMEM budget: double-buffered x/out tiles + single-buffered weight/bias.
    vmem_need = (2 * tb * dim * x_itemsize
                 + dim * OUT_PAD * jnp.dtype(w_use.dtype).itemsize
                 + OUT_PAD * 4
                 + 2 * tb * OUT_PAD * 2)
    vmem_limit = int(min(max(2 * vmem_need, 8 << 20), 32 << 20))

    out_padded = pl.pallas_call(
        _classifier_kernel,
        out_shape=jax.ShapeDtypeStruct((B, OUT_PAD), jnp.bfloat16),
        grid=grid,
        in_specs=[
            pl.BlockSpec((tb, dim), lambda i: (i, 0)),         # x: pipelined per tile
            pl.BlockSpec((dim, OUT_PAD), lambda i: (0, 0),     # weight: VMEM-resident,
                         pipeline_mode=pl.Buffered(1)),        #   single buffer
            pl.BlockSpec((1, OUT_PAD), lambda i: (0, 0),       # bias: VMEM-resident
                         pipeline_mode=pl.Buffered(1)),
        ],
        out_specs=pl.BlockSpec((tb, OUT_PAD), lambda i: (i, 0)),
        compiler_params=pltpu.CompilerParams(
            dimension_semantics=("parallel",),                 # batch tiles shard over v7x's 2 TCs
            vmem_limit_bytes=vmem_limit),
    )(x, w_use, b_p)

    # NOTE: consumers that can operate on the padded (B, 128) bf16 slab (e.g. a fused
    # 2-class softmax / loss) should take `out_padded` directly so this slice fuses.
    return out_padded[:, :OUT_DIM].astype(jnp.float32)


def init_params(key, dim, dtype=jnp.bfloat16):
    """Mirrors Classifier_480.__init__: weight ~ N(0, 0.01), bias = 0.
    Pad/transpose is done ONCE here so the forward hot path has no layout traffic."""
    w = 0.01 * jax.random.normal(key, (OUT_DIM, dim), jnp.float32)   # PyTorch (2, dim) layout
    w_p = jnp.zeros((dim, OUT_PAD), jnp.float32).at[:, :OUT_DIM].set(w.T).astype(dtype)
    b_p = jnp.zeros((1, OUT_PAD), jnp.float32)                        # bias.fill_(0.0)
    return w_p, b_p


def _reference(x, w_p, b_p, norm_flag):
    """Plain-JAX eval of the same (bf16-quantized) parameters, f32 math."""
    w = w_p.astype(jnp.float32)[:, :OUT_DIM]                          # (dim, 2) == weight.T
    if norm_flag:
        w = w * jax.lax.rsqrt(jnp.sum(w * w, axis=1, keepdims=True) + _EPS)
        w = w.astype(w_p.dtype).astype(jnp.float32)
    xq = x.astype(w_p.dtype).astype(jnp.float32)                      # mirror in-kernel bf16 cast
    return xq @ w + b_p[0, :OUT_DIM]


if __name__ == "__main__":
    key = jax.random.PRNGKey(0)
    kx, kw = jax.random.split(key)

    dim = 512
    w_p, b_p = init_params(kw, dim)

    ok = True
    # B=8: exact tile; B=10: exercises the cdiv partial last block (no jnp.pad).
    for B in (8, 10):
        x = jax.random.normal(kx, (B, dim), jnp.float32)
        for norm_flag in (False, True):
            out = jax.block_until_ready(classifier_forward(x, w_p, b_p, norm_flag))
            ref = _reference(x, w_p, b_p, norm_flag)
            assert out.shape == (B, OUT_DIM)
            ok = ok and bool(jnp.allclose(out, ref, rtol=2e-2, atol=5e-2))

    assert ok
    print("KERNEL_OK")
</pallas_src>

<mosaic_0001>
module attributes {stable_mosaic.version = 11 : i64} {
  func.func @_classifier_kernel(%arg0: i32, %arg1: memref<8x512xf32, #tpu.memory_space<vmem>>, %arg2: memref<512x128xbf16, #tpu.memory_space<vmem>>, %arg3: memref<1x128xf32, #tpu.memory_space<vmem>>, %arg4: memref<8x128xbf16, #tpu.memory_space<vmem>>) attributes {dimension_semantics = [#tpu.dimension_semantics<parallel>], iteration_bounds = array<i64: 1>, scalar_prefetch = 0 : i64, scratch_operands = 0 : i64, tpu.core_type = #tpu.core_type<tc>, window_params = [{transform_indices = @transform_0, window_bounds = array<i64: 8, 512>}, {pipeline_mode = #tpu.pipeline_mode<synchronous>, transform_indices = @transform_1, window_bounds = array<i64: 512, 128>}, {pipeline_mode = #tpu.pipeline_mode<synchronous>, transform_indices = @transform_2, window_bounds = array<i64: 1, 128>}, {transform_indices = @transform_3, window_bounds = array<i64: 8, 128>}]} {
    %c0 = arith.constant 0 : index
    %c0_0 = arith.constant 0 : index
    %0 = vector.load %arg1[%c0, %c0_0] : memref<8x512xf32, #tpu.memory_space<vmem>>, vector<8x512xf32>
    %1 = arith.truncf %0 : vector<8x512xf32> to vector<8x512xbf16>
    %c0_1 = arith.constant 0 : index
    %c0_2 = arith.constant 0 : index
    %2 = vector.load %arg2[%c0_1, %c0_2] : memref<512x128xbf16, #tpu.memory_space<vmem>>, vector<512x128xbf16>
    %cst = arith.constant dense<0.000000e+00> : vector<8x128xf32>
    %3 = tpu.matmul %1, %2, %cst {dimension_numbers = #tpu.dot_dimension_numbers<[1], [0], [0], [1], [0, 0, 1, 1], [], []>} : vector<8x512xbf16>, vector<512x128xbf16>, vector<8x128xf32> -> vector<8x128xf32>
    %c0_3 = arith.constant 0 : index
    %c0_4 = arith.constant 0 : index
    %4 = vector.load %arg3[%c0_3, %c0_4] : memref<1x128xf32, #tpu.memory_space<vmem>>, vector<1x128xf32>
    %5 = vector.broadcast %4 : vector<1x128xf32> to vector<8x128xf32>
    %6 = arith.addf %3, %5 : vector<8x128xf32>
    %7 = arith.truncf %6 : vector<8x128xf32> to vector<8x128xbf16>
    %c0_5 = arith.constant 0 : index
    %c0_6 = arith.constant 0 : index
    %8 = vector.load %arg4[%c0_5, %c0_6] : memref<8x128xbf16, #tpu.memory_space<vmem>>, vector<8x128xbf16>
    tpu.vector_store %arg4[%c0_5, %c0_6], %7 {strides = array<i32>} : memref<8x128xbf16, #tpu.memory_space<vmem>>, vector<8x128xbf16>,
    return
  }
  func.func @transform_0(%arg0: i32) -> (i32, i32) {
    %c0_i32 = arith.constant 0 : i32
    %c0_i32_0 = arith.constant 0 : i32
    return %arg0, %c0_i32 : i32, i32
  }
  func.func @transform_1(%arg0: i32) -> (i32, i32) {
    %c0_i32 = arith.constant 0 : i32
    %c0_i32_0 = arith.constant 0 : i32
    %c0_i32_1 = arith.constant 0 : i32
    return %c0_i32, %c0_i32_0 : i32, i32
  }
  func.func @transform_2(%arg0: i32) -> (i32, i32) {
    %c0_i32 = arith.constant 0 : i32
    %c0_i32_0 = arith.constant 0 : i32
    %c0_i32_1 = arith.constant 0 : i32
    return %c0_i32, %c0_i32_0 : i32, i32
  }
  func.func @transform_3(%arg0: i32) -> (i32, i32) {
    %c0_i32 = arith.constant 0 : i32
    %c0_i32_0 = arith.constant 0 : i32
    return %arg0, %c0_i32 : i32, i32
  }
}

</mosaic_0001>

<bundles_post_ra>
// kernel: tpu_custom_call.1
= control target key start
LH: loop header
LB: loop body
LE: loop exit
PB: predicated region body
PF: predicated region fallthrough
CT: control target
= control target key end

     0   :  { %8 = vsyncpa [#allocation3], 0  ;;  %s668_s0 = inlined_call_operand.hbm [shape: f32[8,512], index: 0, kind: input, shape index: {}]   ;;  %s669_s1 = inlined_call_operand.hbm [shape: bf16[512,128], index: 1, kind: input, shape index: {}]   ;;  %s670_s2 = inlined_call_operand.vmem [shape: f32[1,128], index: 2, kind: input, shape index: {}]   ;;  %s671_s3 = inlined_call_operand.hbm [shape: bf16[8,128], index: 3, kind: output, shape index: {}]  }
   0x1   :  { %9 = vsyncpa [#allocation6], 0 }
   0x2   :  { %10 = vsyncpa [#allocation4], 0  ;;  %s597_s12 = smov [#allocation2]   ;;  %s598_s14 = smov [#allocation5]  }
   0x3   :  { %s17_s13 = sshll.u32 %s597_s12, 4  ;;  %s26_s15 = sshll.u32 %s598_s14, 4  ;;  %s18_s13 = int_to_ptr.vmem [resolvable:$true] %s17_s13  ;;  %s622_s15 = int_to_ptr.vmem [resolvable:$true] %s26_s15 }
   0x4   :  { %s525_s18 = scalar_lea.hbm %s668_s0, 512 }
   0x5   :  { %p526_p0 = scmp.ne.s32.totalorder %s668_s0, %s525_s18  ;;  %p529_p1 = scmp.lt.u32.totalorder %s525_s18, %s668_s0 }
   0x7   :  { %p531_p2 = pnand %p529_p1, %p526_p0 }
   0x9   :  { %534 = shalt.err (!%p531_p2)
}
   0xa   :  { %s535_s23 = scalar_lea.vmem %s18_s13, 512  ;;  %p540_p4 = scmp.lt.s32.totalorder %s18_s13, %s18_s13 }
   0xb   :  { %p536_p3 = scmp.ne.s32.totalorder %s18_s13, %s535_s23  ;;  %p541_p5 = scmp.lt.s32.totalorder %s535_s23, %s535_s23 }
   0xd   :  { %p542_p6 = por %p541_p5, %p540_p4 }
   0xf   :  { %p543_p7 = pnand %p542_p6, %p536_p3 }
  0x11   :  { %546 = shalt.err (!%p543_p7)
}
  0x12   :  { %20 = dma.hbm_to_vmem [thread:$0]  %s668_s0, 512, %s18_s13, [#allocation3]  }
  0x13   :  { %s547_s28 = scalar_lea.hbm %s669_s1, 4096 }
  0x14   :  { %p548_p8 = scmp.ne.s32.totalorder %s669_s1, %s547_s28  ;;  %p551_p9 = scmp.lt.u32.totalorder %s547_s28, %s669_s1 }
  0x16   :  { %p553_p10 = pnand %p551_p9, %p548_p8 }
  0x18   :  { %556 = shalt.err (!%p553_p10)
}
  0x19   :  { %s557_s6 = scalar_lea.vmem %s622_s15, 4096  ;;  %p562_p12 = scmp.lt.s32.totalorder %s622_s15, %s622_s15 }
  0x1a   :  { %p558_p11 = scmp.ne.s32.totalorder %s622_s15, %s557_s6  ;;  %p563_p13 = scmp.lt.s32.totalorder %s557_s6, %s557_s6 }
  0x1c   :  { %p564_p0 = por %p563_p13, %p562_p12 }
  0x1e   :  { %p565_p1 = pnand %p564_p0, %p558_p11 }
  0x20   :  { %568 = shalt.err (!%p565_p1)
}
  0x21   :  { %s599_s0 = smov 64   ;;  %s600_s7 = smov 4  }
  0x22   :  { %32 = dma.hbm_to_vmem [thread:$0]  %s669_s1, 4096, %s622_s15, [#allocation6], %s599_s0, %s599_s0, %s600_s7  }
  0x23   :  { %591 = dma.done.wait [#allocation3], 512  }
  0x24   :  { %592 = vsyncadd [#allocation3], 4294966784 }
  0x25   :  { %593 = dma.done.wait [#allocation6], 4096  }
  0x26   :  { %594 = vsyncadd [#allocation6], 4294963200  ;;  %v493_v0 = vld [vmem:[#allocation5 + $0x40] sm:$0xff]   ;;  %v497_v4 = vld [vmem:[#allocation5 + $0x48] sm:$0xff]   ;;  %s601_s11 = smov [#allocation7]  }
  0x27   :  { %v494_v1 = vld [vmem:[#allocation5 + $0xc0] sm:$0xff]   ;;  %444 = vmatprep.subr.bf16.mxu0 %v493_v0  ;;  %v498_v5 = vld [vmem:[#allocation5 + $0xc8] sm:$0xff]   ;;  %v501_v8 = vld [vmem:[#allocation5 + $0x50] sm:$0xff]   ;;  %s401_s12 = sshll.u32 %s601_s11, 4  ;;  %s402_s12 = int_to_ptr.vmem [resolvable:$true] %s401_s12 }
  0x28   :  { %v495_v2 = vld [vmem:[#allocation5] sm:$0xff]   ;;  %466 = vmatprep.subr.bf16.mxu1 %v494_v1  ;;  %v499_v6 = vld [vmem:[#allocation5 + $0x8] sm:$0xff]   ;;  %v502_v9 = vld [vmem:[#allocation5 + $0xd0] sm:$0xff]   ;;  %s569_s13 = scalar_lea.vmem %s402_s12, 64  ;;  %p574_p3 = scmp.lt.s32.totalorder %s402_s12, %s402_s12 }
  0x29   :  { %v496_v3 = vld [vmem:[#allocation5 + $0x80] sm:$0xff]   ;;  %445 = vmatpush3.bf16.msra.mxu0 %v495_v2  ;;  %v500_v7 = vld [vmem:[#allocation5 + $0x88] sm:$0xff]   ;;  %v503_v10 = vld [vmem:[#allocation5 + $0x10] sm:$0xff]   ;;  %p570_p2 = scmp.ne.s32.totalorder %s402_s12, %s569_s13  ;;  %p575_p4 = scmp.lt.s32.totalorder %s569_s13, %s569_s13 }
  0x2a   :  { %467 = vmatpush3.bf16.msra.mxu1 %v496_v3  ;;  %446 = vmatprep.subr.bf16.mxu0 %v497_v4  ;;  %v504_v11 = vld [vmem:[#allocation5 + $0x90] sm:$0xff]   ;;  %v505_v12 = vld [vmem:[#allocation5 + $0x58] sm:$0xff]   ;;  %v509_v16 = vld [vmem:[#allocation5 + $0x60] sm:$0xff]  }
  0x2b   :  { %468 = vmatprep.subr.bf16.mxu1 %v498_v5  ;;  %v506_v13 = vld [vmem:[#allocation5 + $0xd8] sm:$0xff]   ;;  %v510_v17 = vld [vmem:[#allocation5 + $0xe0] sm:$0xff]   ;;  %v513_v20 = vld [vmem:[#allocation5 + $0x68] sm:$0xff]   ;;  %p576_p5 = por %p575_p4, %p574_p3 }
  0x2c   :  { %v507_v14 = vld [vmem:[#allocation5 + $0x18] sm:$0xff]   ;;  %v511_v18 = vld [vmem:[#allocation5 + $0x20] sm:$0xff]   ;;  %v514_v21 = vld [vmem:[#allocation5 + $0xe8] sm:$0xff]  }
  0x2d   :  { %447 = vmatpush3.bf16.msra.mxu0 %v499_v6  ;;  %v508_v15 = vld [vmem:[#allocation5 + $0x98] sm:$0xff]   ;;  %v512_v19 = vld [vmem:[#allocation5 + $0xa0] sm:$0xff]   ;;  %v515_v22 = vld [vmem:[#allocation5 + $0x28] sm:$0xff]   ;;  %p577_p6 = pnand %p576_p5, %p570_p2 }
  0x2e   :  { %469 = vmatpush3.bf16.msra.mxu1 %v500_v7  ;;  %448 = vmatprep.subr.bf16.mxu0 %v501_v8  ;;  %v516_v23 = vld [vmem:[#allocation5 + $0xa8] sm:$0xff]   ;;  %v517_v24 = vld [vmem:[#allocation5 + $0x70] sm:$0xff]   ;;  %v521_v28 = vld [vmem:[#allocation5 + $0x78] sm:$0xff]  }
  0x2f   :  { %470 = vmatprep.subr.bf16.mxu1 %v502_v9  ;;  %v518_v25 = vld [vmem:[#allocation5 + $0xf0] sm:$0xff]   ;;  %v522_v29 = vld [vmem:[#allocation5 + $0xf8] sm:$0xff]   ;;  %v43_v32 = vld [vmem:[#allocation2 + $0x8] sm:$0xff] }
  0x30   :  { %v519_v26 = vld [vmem:[#allocation5 + $0x30] sm:$0xff]   ;;  %v523_v30 = vld [vmem:[#allocation5 + $0x38] sm:$0xff]   ;;  %v42_v34 = vld [vmem:[#allocation2] sm:$0xff]  ;;  %v47_v35 = vpack.c.bf16 %v43_v32, %v43_v32 }
  0x31   :  { %449 = vmatpush3.bf16.msra.mxu0 %v503_v10  ;;  %v520_v27 = vld [vmem:[#allocation5 + $0xb0] sm:$0xff]   ;;  %v524_v31 = vld [vmem:[#allocation5 + $0xb8] sm:$0xff]   ;;  %v46_v37 = vpack.c.bf16 %v42_v34, %v42_v34  ;;  %v411_v42 = vld [vmem:[%s670_s2] ss:$0 sm:$0xff] }
  0x32   :  { %471 = vmatpush3.bf16.msra.mxu1 %v504_v11  ;;  %450 = vmatprep.subr.bf16.mxu0 %v505_v12  ;;  %v45_v33 = vld [vmem:[#allocation2 + $0x18] sm:$0xff]  ;;  %v44_v38 = vld [vmem:[#allocation2 + $0x10] sm:$0xff] }
  0x33   :  { %472 = vmatprep.subr.bf16.mxu1 %v506_v13  ;;  %v49_v36 = vpack.c.bf16 %v45_v33, %v45_v33  ;;  %v48_v39 = vpack.c.bf16 %v44_v38, %v44_v38  ;;  %345 = vmatprep.mubr.bf16.mxu0 %v47_v35 }
  0x35   :  { %451 = vmatpush3.bf16.msra.mxu0 %v507_v14  ;;  %385 = vmatprep.mubr.bf16.mxu1 %v49_v36 }
  0x36   :  { %473 = vmatpush3.bf16.msra.mxu1 %v508_v15  ;;  %452 = vmatprep.subr.bf16.mxu0 %v509_v16 }
  0x37   :  { %474 = vmatprep.subr.bf16.mxu1 %v510_v17 }
  0x39   :  { %453 = vmatpush3.bf16.msra.mxu0 %v511_v18 }
  0x3a   :  { %475 = vmatpush3.bf16.msra.mxu1 %v512_v19  ;;  %454 = vmatprep.subr.bf16.mxu0 %v513_v20 }
  0x3b   :  { %476 = vmatprep.subr.bf16.mxu1 %v514_v21 }
  0x3d   :  { %455 = vmatpush3.bf16.msra.mxu0 %v515_v22 }
  0x3e   :  { %477 = vmatpush3.bf16.msra.mxu1 %v516_v23  ;;  %456 = vmatprep.subr.bf16.mxu0 %v517_v24 }
  0x3f   :  { %478 = vmatprep.subr.bf16.mxu1 %v518_v25 }
  0x41   :  { %457 = vmatpush3.bf16.msra.mxu0 %v519_v26 }
  0x42   :  { %479 = vmatpush3.bf16.msra.mxu1 %v520_v27  ;;  %458 = vmatprep.subr.bf16.mxu0 %v521_v28 }
  0x43   :  { %480 = vmatprep.subr.bf16.mxu1 %v522_v29 }
  0x45   :  { %459 = vmatpush3.bf16.msra.mxu0 %v523_v30 }
  0x46   :  { %481 = vmatpush3.bf16.msra.mxu1 %v524_v31 }
  0x48   :  { %346 = vmatmul.mubr.bf16.vlgmr.msra.gmra.mrb[0].mxu0 %v46_v37 }
  0x49   :  { %386 = vmatmul.mubr.bf16.vlgmr.msra.gmra.mrb[0].mxu1 %v48_v39 }
 0x11b   :  { %v460_v40 = vpop.f32.mrb[0].mxu0 }
 0x11c   :  { %v482_v41 = vpop.f32.mrb[0].mxu1  ;;  %v461_v43 = vpop.f32.mrb[1].mxu0 }
 0x11d   :  { %v483_v44 = vpop.f32.mrb[1].mxu1  ;;  %v462_v45 = vadd.f32 %v461_v43, %v460_v40  ;;  %v463_v47 = vpop.f32.mrb[2].mxu0 }
 0x11e   :  { %v484_v46 = vadd.f32 %v483_v44, %v482_v41  ;;  %v485_v48 = vpop.f32.mrb[2].mxu1  ;;  %v464_v49 = vpop.f32.mrb[3].mxu0 }
 0x11f   :  { %v486_v50 = vpop.f32.mrb[3].mxu1  ;;  %v348_v51 = vadd.f32 %v462_v45, %v411_v42 }
 0x121   :  { %v388_v52 = vadd.f32 %v484_v46, %v348_v51 }
 0x123   :  { %v393_v53 = vpack.c.bf16 %v388_v52, %v388_v52 }
 0x125   :  { %394 = vst [vmem:[#allocation7] sm:$0xf] %v393_v53 }
 0x126   :  { %580 = shalt.err (!%p577_p6)
}
 0x127   :  { %s581_s15 = scalar_lea.hbm %s671_s3, 64 }
 0x128   :  { %p582_p7 = scmp.ne.s32.totalorder %s671_s3, %s581_s15  ;;  %p585_p8 = scmp.lt.u32.totalorder %s581_s15, %s671_s3 }
 0x12a   :  { %p587_p9 = pnand %p585_p8, %p582_p7 }
 0x12c   :  { %590 = shalt.err (!%p587_p9)
}
 0x12d   :  { %404 = dma.vmem_to_hbm [thread:$0]  %s402_s12, 64, %s671_s3, [#allocation4]  }
 0x12e   :  { %595 = dma.done.wait [#allocation4], 64  }
 0x12f   :  { %596 = vsyncadd [#allocation4], 4294967232 }
 0x130   :  { %408 = vsyncpa [#allocation3], 1 }
 0x131   :  { %409 = vsyncpa [#allocation6], 1 }
 0x132   :  { %410 = vsyncpa [#allocation4], 1 }

</bundles_post_ra>
